<compile_context>
chip_gen: v5e
topology: v5e:2x2
jax: 0.10.0
libtpu: 0.0.40
codegen_flags: <defaults>
</compile_context>

<pallas_src>
import functools

import jax
import jax.numpy as jnp
import numpy as np
from jax.experimental import pallas as pl
from jax.experimental.pallas import tpu as pltpu


# ----------------------------------------------------------------------------
# Kernels
# ----------------------------------------------------------------------------

def _sigmoid_f32(x):
    # Exact sigmoid with a single EUP transcendental (tanh) per element instead
    # of exp + reciprocal; keeps the kernel HBM-bound even on v7x with bf16.
    return 0.5 + 0.5 * jnp.tanh(0.5 * x)


def _dice_acc_kernel(pr_ref, gt_ref, dice_ref, tp_acc, den_acc, *,
                     d_total, td, eps):
    """grid = (batch_tiles, d_tiles); axis 1 reduces into VMEM-resident accumulators."""
    k = pl.program_id(1)
    last = pl.num_programs(1) - 1

    @pl.when(k == 0)
    def _init():
        tp_acc[...] = jnp.zeros_like(tp_acc)
        den_acc[...] = jnp.zeros_like(den_acc)

    x = pr_ref[...].astype(jnp.float32)   # PyTorch: y_pr.float() before sigmoid
    g = gt_ref[...].astype(jnp.float32)
    p = _sigmoid_f32(x)

    def _accumulate(p_, g_):
        tp_acc[...] += jnp.sum(g_ * p_, axis=-1, keepdims=True)
        den_acc[...] += jnp.sum(p_ + g_, axis=-1, keepdims=True)  # sum_pred + sum_gt

    if d_total % td != 0:
        # Pay the tail mask only on the last D tile; all other steps run the
        # unmasked fast path.
        @pl.when(k != last)
        def _fast():
            _accumulate(p, g)

        @pl.when(k == last)
        def _tail():
            col = jax.lax.broadcasted_iota(jnp.int32, p.shape, dimension=1)
            valid = (col + k * td) < d_total
            # Mask BOTH p and g before the product / sums (padded lanes may be
            # stale VMEM garbage / NaN).
            _accumulate(jnp.where(valid, p, 0.0), jnp.where(valid, g, 0.0))
    else:
        _accumulate(p, g)

    @pl.when(k == last)
    def _finalize():
        # dice = (2*tp+eps)/(2*tp+fp+fn+eps); 2*tp+fp+fn == sum_pred + sum_gt.
        dice_ref[...] = (2.0 * tp_acc[...] + eps) / (den_acc[...] + eps)


def _dice_partial_kernel(pr_ref, gt_ref, tp_ref, den_ref, *, d_total, td):
    """grid = (d_tiles,), fully parallel: each step writes its own partial block.

    Used when the batch collapses to a single tile so that the D axis (and not
    the degenerate batch axis) is the parallel one (v7x: 2 TensorCores).
    """
    k = pl.program_id(0)
    last = pl.num_programs(0) - 1

    x = pr_ref[...].astype(jnp.float32)
    g = gt_ref[...].astype(jnp.float32)
    p = _sigmoid_f32(x)

    def _emit(p_, g_):
        tp = jnp.sum(g_ * p_, axis=-1, keepdims=True)
        den = jnp.sum(p_ + g_, axis=-1, keepdims=True)
        # Broadcast (n,1) -> (n,128) so the output block stays lane-legal; the
        # extra write traffic (n * d_tiles * 128 * 4 B) is negligible.
        tp_ref[...] = jnp.broadcast_to(tp, tp_ref.shape)
        den_ref[...] = jnp.broadcast_to(den, den_ref.shape)

    if d_total % td != 0:
        @pl.when(k != last)
        def _fast():
            _emit(p, g)

        @pl.when(k == last)
        def _tail():
            col = jax.lax.broadcasted_iota(jnp.int32, p.shape, dimension=1)
            valid = (col + k * td) < d_total
            _emit(jnp.where(valid, p, 0.0), jnp.where(valid, g, 0.0))
    else:
        _emit(p, g)


# ----------------------------------------------------------------------------
# Tiling helpers (generation-aware)
# ----------------------------------------------------------------------------

def _vmem_budget():
    try:
        cap = int(pltpu.get_tpu_info().vmem_capacity_bytes)
    except Exception:
        cap = 64 * 1024 * 1024  # conservative fallback (v7x per-TensorCore)
    # 48 MiB scoped limit on v7x (64 MiB physical), 96 MiB on v5e/v6e (128 MiB).
    vmem_limit = min(cap * 3 // 4, 96 * 1024 * 1024)
    tile_budget = vmem_limit * 3 // 4
    return vmem_limit, tile_budget


def _pick_batch_tile(n, sublane):
    """Largest divisor of n that is a multiple of `sublane` while leaving >= 2
    batch tiles (so the parallel axis can shard across v7x's 2 TensorCores);
    falls back to multiples of 8, then to the full batch dim (always legal)."""
    for sl in (sublane, 8):
        if n >= 2 * sl:
            start = (n // 2) // sl * sl
            for cand in range(start, sl - 1, -sl):
                if cand > 0 and n % cand == 0:
                    return cand
    return n


def _pick_d_tile(d, tn, in_itemsize, tile_budget):
    # Per tile element we pay: 2 inputs x 2 pipeline buffers x itemsize for the
    # streamed data, plus ~4 live full-tile f32 temporaries inside the kernel.
    per_elem = 4 * in_itemsize + 16
    max_elems = max(tile_budget // per_elem, 128 * tn)
    max_td = max_elems // tn
    if d <= max_td:
        return d                          # single tile (full dim: always legal)
    return max(128, (max_td // 128) * 128)


# ----------------------------------------------------------------------------
# Wrapper
# ----------------------------------------------------------------------------

def soft_dice_loss_with_logits(y_pr, y_gt, eps=1e-5, *,
                               compute_dtype=jnp.bfloat16,
                               block_batch=None, block_d=None,
                               vmem_limit_bytes=None):
    """Pallas equivalent of SoftDiceLossWithLogits.forward (NCHW or any shape).

    compute_dtype: dtype the two input streams are fed to the kernel in
      (accumulation is always f32 in-kernel).  bf16 halves HBM traffic; gt
      values of 0/1 are exact in bf16 and bf16 logits perturb the sigmoid by
      ~1e-3 relative (intentional precision trade).  Pass None to stream the
      original dtype.  In a fused pipeline the upstream op should emit bf16
      directly so the wrapper-side cast is free.
    """
    n = y_pr.shape[0]
    pr = y_pr.reshape(n, -1)
    gt = y_gt.reshape(n, -1)
    if compute_dtype is not None:
        pr = pr.astype(compute_dtype)
        gt = gt.astype(compute_dtype)
    d = pr.shape[1]
    itemsize = max(jnp.dtype(pr.dtype).itemsize, jnp.dtype(gt.dtype).itemsize)

    default_limit, tile_budget = _vmem_budget()
    if vmem_limit_bytes is None:
        vmem_limit_bytes = default_limit
    else:
        tile_budget = vmem_limit_bytes * 3 // 4

    sublane = 16 if itemsize < 4 else 8
    tn = block_batch if block_batch is not None else _pick_batch_tile(n, sublane)
    td = block_d if block_d is not None else _pick_d_tile(d, tn, itemsize, tile_budget)
    td = min(td, d)

    batch_tiles = pl.cdiv(n, tn)
    d_tiles = pl.cdiv(d, td)

    if batch_tiles == 1 and d_tiles > 1:
        # Degenerate batch axis: parallelize over D by emitting per-tile partial
        # sums; the tiny combine + dice happens in the JAX epilogue.
        kernel = functools.partial(_dice_partial_kernel, d_total=d, td=td)
        tp_part, den_part = pl.pallas_call(
            kernel,
            out_shape=(jax.ShapeDtypeStruct((n, d_tiles * 128), jnp.float32),
                       jax.ShapeDtypeStruct((n, d_tiles * 128), jnp.float32)),
            grid_spec=pltpu.PrefetchScalarGridSpec(
                num_scalar_prefetch=0,
                grid=(d_tiles,),
                in_specs=[pl.BlockSpec((n, td), lambda k: (0, k)),
                          pl.BlockSpec((n, td), lambda k: (0, k))],
                out_specs=(pl.BlockSpec((n, 128), lambda k: (0, k)),
                           pl.BlockSpec((n, 128), lambda k: (0, k))),
            ),
            compiler_params=pltpu.CompilerParams(
                dimension_semantics=("parallel",),
                vmem_limit_bytes=int(vmem_limit_bytes),
            ),
        )(pr, gt)
        tp = jnp.sum(tp_part[:, ::128], axis=1)
        den = jnp.sum(den_part[:, ::128], axis=1)
        dice = (2.0 * tp + eps) / (den + eps)
    else:
        kernel = functools.partial(_dice_acc_kernel, d_total=d, td=td,
                                   eps=float(eps))
        dice2d = pl.pallas_call(
            kernel,
            out_shape=jax.ShapeDtypeStruct((n, 1), jnp.float32),
            grid_spec=pltpu.PrefetchScalarGridSpec(
                num_scalar_prefetch=0,
                grid=(batch_tiles, d_tiles),
                in_specs=[pl.BlockSpec((tn, td), lambda i, k: (i, k)),
                          pl.BlockSpec((tn, td), lambda i, k: (i, k))],
                # Output does not vary along the D axis -> stays VMEM-resident.
                out_specs=pl.BlockSpec((tn, 1), lambda i, k: (i, 0)),
                scratch_shapes=[pltpu.VMEM((tn, 1), jnp.float32)] * 2,
            ),
            compiler_params=pltpu.CompilerParams(
                dimension_semantics=("parallel", "arbitrary"),
                vmem_limit_bytes=int(vmem_limit_bytes),
            ),
        )(pr, gt)
        dice = dice2d[:, 0]

    # Tiny epilogue stays in plain JAX.
    return 1.0 - jnp.mean(dice)


# ----------------------------------------------------------------------------
# Reference + test
# ----------------------------------------------------------------------------

def _reference(y_pr, y_gt, eps=1e-5):
    n = y_pr.shape[0]
    pr = jax.nn.sigmoid(y_pr.astype(jnp.float32)).reshape(n, -1)
    gt = y_gt.astype(jnp.float32).reshape(n, -1)
    tp = jnp.sum(gt * pr, axis=1)
    fp = jnp.sum(pr, axis=1) - tp
    fn = jnp.sum(gt, axis=1) - tp
    dice = (2.0 * tp + eps) / (2.0 * tp + fp + fn + eps)
    return 1.0 - jnp.mean(dice)


if __name__ == "__main__":
    key = jax.random.PRNGKey(0)
    k1, k2 = jax.random.split(key)

    # Shapes implied by the module (NCHW segmentation logits / binary masks).
    N, C, H, W = 2, 4, 16, 16
    y_pr = jax.random.normal(k1, (N, C, H, W), dtype=jnp.float32)          # logits
    y_gt = (jax.random.uniform(k2, (N, C, H, W)) > 0.5).astype(jnp.float32)

    ref = jax.block_until_ready(_reference(y_pr, y_gt))

    # 1) Default path: auto tile sizing (single D tile here), accumulator kernel.
    loss = jax.block_until_ready(jax.jit(soft_dice_loss_with_logits)(y_pr, y_gt))
    np.testing.assert_allclose(np.asarray(loss), np.asarray(ref),
                               rtol=1e-2, atol=1e-2)

    # 2) Force small D tiles: exercises the D-parallel partial-sum variant
    #    (single batch tile, multiple D tiles) plus last-tile masking.
    loss2 = jax.block_until_ready(
        jax.jit(functools.partial(soft_dice_loss_with_logits, block_d=384))(
            y_pr, y_gt))
    np.testing.assert_allclose(np.asarray(loss2), np.asarray(ref),
                               rtol=1e-2, atol=1e-2)

    # 3) Multi-batch-tile accumulator path with a masked tail D tile.
    N2, D2 = 32, 640
    y_pr2 = jax.random.normal(k1, (N2, D2), dtype=jnp.float32)
    y_gt2 = (jax.random.uniform(k2, (N2, D2)) > 0.5).astype(jnp.float32)
    ref3 = jax.block_until_ready(_reference(y_pr2, y_gt2))
    loss3 = jax.block_until_ready(
        jax.jit(functools.partial(soft_dice_loss_with_logits,
                                  block_batch=16, block_d=256))(y_pr2, y_gt2))
    np.testing.assert_allclose(np.asarray(loss3), np.asarray(ref3),
                               rtol=1e-2, atol=1e-2)

    print("KERNEL_OK")
</pallas_src>

<mosaic_0001>
module attributes {stable_mosaic.version = 11 : i64} {
  func.func @_dice_acc_kernel(%arg0: i32, %arg1: i32, %arg2: memref<2x1024xbf16, #tpu.memory_space<vmem>>, %arg3: memref<2x1024xbf16, #tpu.memory_space<vmem>>, %arg4: memref<2x1xf32, #tpu.memory_space<vmem>>, %arg5: memref<2x1xf32, #tpu.memory_space<vmem>>, %arg6: memref<2x1xf32, #tpu.memory_space<vmem>>) attributes {dimension_semantics = [#tpu.dimension_semantics<parallel>, #tpu.dimension_semantics<arbitrary>], iteration_bounds = array<i64: 1, 1>, scalar_prefetch = 0 : i64, scratch_operands = 2 : i64, tpu.core_type = #tpu.core_type<tc>, window_params = [{transform_indices = @transform_0, window_bounds = array<i64: 2, 1024>}, {transform_indices = @transform_1, window_bounds = array<i64: 2, 1024>}, {transform_indices = @transform_2, window_bounds = array<i64: 2, 1>}]} {
    %c0_i32 = arith.constant 0 : i32
    %0 = arith.cmpi eq, %arg1, %c0_i32 : i32
    %1 = arith.extui %0 : i1 to i32
    %c0_i32_0 = arith.constant 0 : i32
    %2 = arith.cmpi ne, %1, %c0_i32_0 : i32
    scf.if %2 {
      %cst_18 = arith.constant 0.000000e+00 : f32
      %29 = vector.broadcast %cst_18 : f32 to vector<2x1xf32>
      %c0_19 = arith.constant 0 : index
      %c0_20 = arith.constant 0 : index
      %30 = vector.load %arg5[%c0_19, %c0_20] : memref<2x1xf32, #tpu.memory_space<vmem>>, vector<2x1xf32>
      tpu.vector_store %arg5[%c0_19, %c0_20], %29 {strides = array<i32>} : memref<2x1xf32, #tpu.memory_space<vmem>>, vector<2x1xf32>,
      %cst_21 = arith.constant 0.000000e+00 : f32
      %31 = vector.broadcast %cst_21 : f32 to vector<2x1xf32>
      %c0_22 = arith.constant 0 : index
      %c0_23 = arith.constant 0 : index
      %32 = vector.load %arg6[%c0_22, %c0_23] : memref<2x1xf32, #tpu.memory_space<vmem>>, vector<2x1xf32>
      tpu.vector_store %arg6[%c0_22, %c0_23], %31 {strides = array<i32>} : memref<2x1xf32, #tpu.memory_space<vmem>>, vector<2x1xf32>,
    } else {
    }
    %c0 = arith.constant 0 : index
    %c0_1 = arith.constant 0 : index
    %3 = vector.load %arg2[%c0, %c0_1] : memref<2x1024xbf16, #tpu.memory_space<vmem>>, vector<2x1024xbf16>
    %4 = arith.extf %3 : vector<2x1024xbf16> to vector<2x1024xf32>
    %c0_2 = arith.constant 0 : index
    %c0_3 = arith.constant 0 : index
    %5 = vector.load %arg3[%c0_2, %c0_3] : memref<2x1024xbf16, #tpu.memory_space<vmem>>, vector<2x1024xbf16>
    %6 = arith.extf %5 : vector<2x1024xbf16> to vector<2x1024xf32>
    %cst = arith.constant 5.000000e-01 : f32
    %7 = vector.broadcast %cst : f32 to vector<2x1024xf32>
    %8 = arith.mulf %7, %4 : vector<2x1024xf32>
    %9 = math.tanh %8 : vector<2x1024xf32>
    %cst_4 = arith.constant 5.000000e-01 : f32
    %10 = vector.broadcast %cst_4 : f32 to vector<2x1024xf32>
    %11 = arith.mulf %10, %9 : vector<2x1024xf32>
    %cst_5 = arith.constant 5.000000e-01 : f32
    %12 = vector.broadcast %cst_5 : f32 to vector<2x1024xf32>
    %13 = arith.addf %12, %11 : vector<2x1024xf32>
    %c0_6 = arith.constant 0 : index
    %c0_7 = arith.constant 0 : index
    %14 = vector.load %arg5[%c0_6, %c0_7] : memref<2x1xf32, #tpu.memory_space<vmem>>, vector<2x1xf32>
    %15 = arith.mulf %6, %13 : vector<2x1024xf32>
    %cst_8 = arith.constant dense<0.000000e+00> : vector<2xf32>
    %16 = vector.multi_reduction <add>, %15, %cst_8 [1] : vector<2x1024xf32> to vector<2xf32>
    %17 = vector.shape_cast %16 : vector<2xf32> to vector<2x1xf32>
    %18 = arith.addf %14, %17 : vector<2x1xf32>
    %c0_9 = arith.constant 0 : index
    %c0_10 = arith.constant 0 : index
    %19 = vector.load %arg5[%c0_9, %c0_10] : memref<2x1xf32, #tpu.memory_space<vmem>>, vector<2x1xf32>
    tpu.vector_store %arg5[%c0_9, %c0_10], %18 {strides = array<i32>} : memref<2x1xf32, #tpu.memory_space<vmem>>, vector<2x1xf32>,
    %c0_11 = arith.constant 0 : index
    %c0_12 = arith.constant 0 : index
    %20 = vector.load %arg6[%c0_11, %c0_12] : memref<2x1xf32, #tpu.memory_space<vmem>>, vector<2x1xf32>
    %21 = arith.addf %13, %6 : vector<2x1024xf32>
    %cst_13 = arith.constant dense<0.000000e+00> : vector<2xf32>
    %22 = vector.multi_reduction <add>, %21, %cst_13 [1] : vector<2x1024xf32> to vector<2xf32>
    %23 = vector.shape_cast %22 : vector<2xf32> to vector<2x1xf32>
    %24 = arith.addf %20, %23 : vector<2x1xf32>
    %c0_14 = arith.constant 0 : index
    %c0_15 = arith.constant 0 : index
    %25 = vector.load %arg6[%c0_14, %c0_15] : memref<2x1xf32, #tpu.memory_space<vmem>>, vector<2x1xf32>
    tpu.vector_store %arg6[%c0_14, %c0_15], %24 {strides = array<i32>} : memref<2x1xf32, #tpu.memory_space<vmem>>, vector<2x1xf32>,
    %c0_i32_16 = arith.constant 0 : i32
    %26 = arith.cmpi eq, %arg1, %c0_i32_16 : i32
    %27 = arith.extui %26 : i1 to i32
    %c0_i32_17 = arith.constant 0 : i32
    %28 = arith.cmpi ne, %27, %c0_i32_17 : i32
    scf.if %28 {
      %c0_18 = arith.constant 0 : index
      %c0_19 = arith.constant 0 : index
      %29 = vector.load %arg5[%c0_18, %c0_19] : memref<2x1xf32, #tpu.memory_space<vmem>>, vector<2x1xf32>
      %cst_20 = arith.constant 2.000000e+00 : f32
      %30 = vector.broadcast %cst_20 : f32 to vector<2x1xf32>
      %31 = arith.mulf %30, %29 : vector<2x1xf32>
      %cst_21 = arith.constant 9.99999974E-6 : f32
      %32 = vector.broadcast %cst_21 : f32 to vector<2x1xf32>
      %33 = arith.addf %31, %32 : vector<2x1xf32>
      %c0_22 = arith.constant 0 : index
      %c0_23 = arith.constant 0 : index
      %34 = vector.load %arg6[%c0_22, %c0_23] : memref<2x1xf32, #tpu.memory_space<vmem>>, vector<2x1xf32>
      %cst_24 = arith.constant 9.99999974E-6 : f32
      %35 = vector.broadcast %cst_24 : f32 to vector<2x1xf32>
      %36 = arith.addf %34, %35 : vector<2x1xf32>
      %37 = arith.divf %33, %36 : vector<2x1xf32>
      %c0_25 = arith.constant 0 : index
      %c0_26 = arith.constant 0 : index
      %38 = vector.load %arg4[%c0_25, %c0_26] : memref<2x1xf32, #tpu.memory_space<vmem>>, vector<2x1xf32>
      tpu.vector_store %arg4[%c0_25, %c0_26], %37 {strides = array<i32>} : memref<2x1xf32, #tpu.memory_space<vmem>>, vector<2x1xf32>,
    } else {
    }
    return
  }
  func.func @transform_0(%arg0: i32, %arg1: i32) -> (i32, i32) {
    %c0_i32 = arith.constant 0 : i32
    return %arg0, %arg1 : i32, i32
  }
  func.func @transform_1(%arg0: i32, %arg1: i32) -> (i32, i32) {
    %c0_i32 = arith.constant 0 : i32
    return %arg0, %arg1 : i32, i32
  }
  func.func @transform_2(%arg0: i32, %arg1: i32) -> (i32, i32) {
    %c0_i32 = arith.constant 0 : i32
    %c0_i32_0 = arith.constant 0 : i32
    return %arg0, %c0_i32 : i32, i32
  }
}

</mosaic_0001>

<bundles_post_ra>
// kernel: soft_dice_loss_with_logits.1
= control target key start
LH: loop header
LB: loop body
LE: loop exit
PB: predicated region body
PF: predicated region fallthrough
CT: control target
= control target key end

     0   :  { %vm56_vm0 = vcmask 1041408   ;;  %vm15_vm1 = vcmask 1024   ;;  %v155_v28 = vmov 0.0   ;;  %s201_s0 = inlined_call_operand.vmem [shape: bf16[2,1024], index: 0, kind: input, shape index: {}]   ;;  %s202_s1 = inlined_call_operand.vmem [shape: bf16[2,1024], index: 1, kind: input, shape index: {}]   ;;  %s203_s2 = inlined_call_operand.vmem [shape: f32[2,1], index: 2, kind: output, shape index: {}]  }
   0x1   :  { %v18_v0 = vld [vmem:[%s201_s0] sm:$0xff]  ;;  %17 = vst.msk [vmem:[#allocation3] sm:$0x3] %vm15_vm1, %v155_v28 }
   0x2   :  { %v19_v1 = vunpack.c.l.bf16 %v18_v0  ;;  %v20_v2 = vunpack.c.h.bf16 %v18_v0  ;;  %v21_v5 = vld [vmem:[%s202_s1] sm:$0xff]  ;;  %16 = vst.msk [vmem:[#allocation2] sm:$0x3] %vm15_vm1, %v155_v28 }
   0x3   :  { %v22_v8 = vunpack.c.l.bf16 %v21_v5  ;;  %v23_v10 = vunpack.c.h.bf16 %v21_v5 }
   0x4   :  { %v24_v3 = vmul.f32 0.5, %v19_v1  ;;  %v25_v4 = vmul.f32 0.5, %v20_v2 }
   0x6   :  { %149 = vtanh.f32 %v24_v3 }
   0x7   :  { %151 = vtanh.f32 %v25_v4 }
   0x8   :  { %v77_v1 = vld [vmem:[#allocation3] sm:$0x3] }
   0x9   :  { %v32_v4 = vld [vmem:[#allocation2] sm:$0x3] }
   0xc   :  { %v150_v6 = vpop.eup %149 }
   0xd   :  { %v152_v7 = vpop.eup %151  ;;  %v28_v9 = vmul.f32 0.5, %v150_v6 }
   0xe   :  { %v29_v11 = vmul.f32 0.5, %v152_v7 }
   0xf   :  { %v30_v12 = vadd.f32 0.5, %v28_v9 }
  0x10   :  { %v31_v13 = vadd.f32 0.5, %v29_v11 }
  0x11   :  { %v33_v14 = vmul.f32 %v30_v12, %v22_v8  ;;  %v78_v18 = vadd.f32 %v30_v12, %v22_v8 }
  0x12   :  { %v34_v15 = vmul.f32 %v31_v13, %v23_v10  ;;  %v79_v21 = vadd.f32 %v31_v13, %v23_v10 }
  0x13   :  { %37 = vst [vmem:[#allocation1] ss:$4 sm:$0xff] %v33_v14 }
  0x14   :  { %39 = vst [vmem:[#allocation1 + $0x20] ss:$4 sm:$0xff] %v34_v15 }
  0x1a   :  { %v40_v16 = vld.sshfl [vmem:[#allocation1] sm:$0xff pattern:$0x73625140]  ;;  %v41_v17 = vld.sshfl [vmem:[#allocation1 + $0x8] sm:$0xff pattern:$0x73625140] }
  0x1b   :  { %v42_v19 = vld.sshfl [vmem:[#allocation1 + $0x10] sm:$0xff pattern:$0x73625140]  ;;  %v43_v20 = vld.sshfl [vmem:[#allocation1 + $0x18] sm:$0xff pattern:$0x73625140] }
  0x1c   :  { %v44_v22 = vld.sshfl [vmem:[#allocation1 + $0x20] sm:$0xff pattern:$0x73625140]  ;;  %v45_v23 = vld.sshfl [vmem:[#allocation1 + $0x28] sm:$0xff pattern:$0x73625140] }
  0x1d   :  { %v46_v24 = vld.sshfl [vmem:[#allocation1 + $0x30] sm:$0xff pattern:$0x73625140]  ;;  %v47_v25 = vld.sshfl [vmem:[#allocation1 + $0x38] sm:$0xff pattern:$0x73625140] }
  0x1e   :  { %82 = vst [vmem:[#allocation1] ss:$4 sm:$0xff] %v78_v18  ;;  %v57_v26 = vsel %vm56_vm0, %v40_v16, 0.0  ;;  %v58_v27 = vsel %vm56_vm0, %v41_v17, 0.0  ;;  %v60_v31 = vsel %vm56_vm0, %v42_v19, 0.0  ;;  %v62_v39 = vsel %vm56_vm0, %v43_v20, 0.0 }
  0x1f   :  { %84 = vst [vmem:[#allocation1 + $0x20] ss:$4 sm:$0xff] %v79_v21  ;;  %v59_v29 = vadd.f32 %v58_v27, %v57_v26  ;;  %v64_v47 = vsel %vm56_vm0, %v44_v22, 0.0  ;;  %v66_v55 = vsel %vm56_vm0, %v45_v23, 0.0  ;;  %v68_v60 = vsel %vm56_vm0, %v46_v24, 0.0 }
  0x20   :  { %v70_v63 = vsel %vm56_vm0, %v47_v25, 0.0 }
  0x21   :  { %v61_v35 = vadd.f32 %v60_v31, %v59_v29 }
  0x23   :  { %v63_v45 = vadd.f32 %v62_v39, %v61_v35 }
  0x25   :  { %v85_v30 = vld.sshfl [vmem:[#allocation1] sm:$0xff pattern:$0x73625140]  ;;  %v86_v32 = vld.sshfl [vmem:[#allocation1 + $0x8] sm:$0xff pattern:$0x73625140]  ;;  %v65_v53 = vadd.f32 %v64_v47, %v63_v45 }
  0x26   :  { %v87_v33 = vld.sshfl [vmem:[#allocation1 + $0x10] sm:$0xff pattern:$0x73625140]  ;;  %v88_v34 = vld.sshfl [vmem:[#allocation1 + $0x18] sm:$0xff pattern:$0x73625140] }
  0x27   :  { %v101_v36 = vsel %vm56_vm0, %v85_v30, 0.0  ;;  %v102_v37 = vsel %vm56_vm0, %v86_v32, 0.0  ;;  %v104_v38 = vsel %vm56_vm0, %v87_v33, 0.0  ;;  %v89_v40 = vld.sshfl [vmem:[#allocation1 + $0x20] sm:$0xff pattern:$0x73625140]  ;;  %v67_v59 = vadd.f32 %v66_v55, %v65_v53 }
  0x28   :  { %v103_v41 = vadd.f32 %v102_v37, %v101_v36  ;;  %v106_v42 = vsel %vm56_vm0, %v88_v34, 0.0  ;;  %v90_v43 = vld.sshfl [vmem:[#allocation1 + $0x28] sm:$0xff pattern:$0x73625140]  ;;  %v108_v46 = vsel %vm56_vm0, %v89_v40, 0.0 }
  0x29   :  { %v91_v48 = vld.sshfl [vmem:[#allocation1 + $0x30] sm:$0xff pattern:$0x73625140]  ;;  %v110_v50 = vsel %vm56_vm0, %v90_v43, 0.0  ;;  %v69_v62 = vadd.f32 %v68_v60, %v67_v59 }
  0x2a   :  { %v105_v44 = vadd.f32 %v104_v38, %v103_v41  ;;  %v92_v51 = vld.sshfl [vmem:[#allocation1 + $0x38] sm:$0xff pattern:$0x73625140]  ;;  %v112_v54 = vsel %vm56_vm0, %v91_v48, 0.0 }
  0x2b   :  { %v114_v57 = vsel %vm56_vm0, %v92_v51, 0.0  ;;  %v71_v0 = vadd.f32 %v70_v63, %v69_v62 }
  0x2c   :  { %v107_v49 = vadd.f32 %v106_v42, %v105_v44 }
  0x2e   :  { %v109_v52 = vadd.f32 %v108_v46, %v107_v49 }
  0x30   :  { %v111_v56 = vadd.f32 %v110_v50, %v109_v52 }
  0x32   :  { %v113_v58 = vadd.f32 %v112_v54, %v111_v56 }
  0x34   :  { %v115_v61 = vadd.f32 %v114_v57, %v113_v58 }
  0x36   :  { %116 = vadd.xlane.f32.xlu0 %v115_v61 }
  0x3e   :  { %72 = vadd.xlane.f32.xlu0 %v71_v0 }
  0xa9   :  { %v117_v2 = vpop.xlane.xlu0 %116 }
  0xaa   :  { %v118_v3 = vadd.f32 %v117_v2, %v77_v1 }
  0xac   :  { %119 = vst.msk [vmem:[#allocation3] sm:$0x3] %vm15_vm1, %v118_v3 }
  0xb1   :  { %v73_v5 = vpop.xlane.xlu0 %72 }
  0xb2   :  { %v74_v6 = vadd.f32 %v73_v5, %v32_v4 }
  0xb3   :  { %v126_v7 = vld [vmem:[#allocation3] sm:$0x3] }
  0xb4   :  { %v127_v8 = vadd.f32 1e-05, %v126_v7  ;;  %76 = vst.msk [vmem:[#allocation2] sm:$0x3] %vm15_vm1, %v74_v6 }
  0xb6   :  { %153 = vrcp.f32 %v127_v8  ;;  %v139_v14 = vand.u32 2147483648, %v127_v8  ;;  %v137_v16 = vand.u32 2147483647, %v127_v8  ;;  %vm133_vm3 = vweird.f32 %v127_v8 }
  0xb8   :  { %v140_v19 = vor.u32 1.1754944e-38, %v139_v14  ;;  %vm138_vm5 = vcmp.eq.f32.partialorder %v137_v16, 8.507059e+37 }
  0xbb   :  { %v123_v10 = vld [vmem:[#allocation2] sm:$0x3] }
  0xbc   :  { %v154_v9 = vpop.eup %153  ;;  %v124_v13 = vmul.f32 2.0, %v123_v10 }
  0xbd   :  { %v129_v11 = vmul.f32 %v154_v9, %v127_v8  ;;  %vm134_vm2 = vweird.f32 %v154_v9 }
  0xbe   :  { %v125_v18 = vadd.f32 1e-05, %v124_v13  ;;  %vm135_vm4 = vmor %vm133_vm3, %vm134_vm2 }
  0xbf   :  { %v130_v12 = vsub.f32 1.0, %v129_v11 }
  0xc1   :  { %v131_v15 = vmul.f32 %v154_v9, %v130_v12 }
  0xc3   :  { %v132_v17 = vadd.f32 %v154_v9, %v131_v15 }
  0xc5   :  { %v136_v20 = vsel %vm135_vm4, %v154_v9, %v132_v17 }
  0xc6   :  { %v141_v21 = vsel %vm138_vm5, %v140_v19, %v136_v20 }
  0xc7   :  { %v142_v22 = vmul.f32 %v141_v21, %v125_v18 }
  0xc9   :  { %143 = vst.msk [vmem:[%s203_s2] sm:$0x3] %vm15_vm1, %v142_v22 }

</bundles_post_ra>
